<compile_context>
chip_gen: v6e
topology: v6e:2x2x1
jax: 0.10.0
libtpu: 0.0.40
codegen_flags: <defaults>
</compile_context>

<pallas_src>
import functools

import jax
import jax.numpy as jnp
from jax import lax
from jax.experimental import pallas as pl
from jax.experimental.pallas import tpu as pltpu


# --------------------------------------------------------------------------- #
# helpers
# --------------------------------------------------------------------------- #
def _cdiv(a, b):
    return (a + b - 1) // b


def _round_up(x, m):
    return _cdiv(x, m) * m


def _sublane(dtype):
    # native sublane packing of a vreg: f32 -> 8 rows, bf16 -> 16, int8/fp8 -> 32
    return max(8, 32 // jnp.dtype(dtype).itemsize)


def _vmem_limit_bytes():
    """Generation-aware scoped-VMEM limit (headroom left for compiler scratch)."""
    cap = 64 * 1024 * 1024  # conservative fallback (v7x physical)
    try:
        info = pltpu.get_tpu_info()
        cap = int(getattr(info, "vmem_capacity_bytes", cap) or cap)
    except Exception:
        pass
    # v5e/v6e (128 MiB) -> 100 MiB ; v7x (64 MiB) -> 48 MiB
    return int(max(32 * 1024 * 1024, min(cap - 16 * 1024 * 1024, 100 * 1024 * 1024)))


# --------------------------------------------------------------------------- #
# kernels
# --------------------------------------------------------------------------- #
def _linear_small_kernel(x_ref, w_ref, b_ref, o_ref):
    # Weight-resident fast path: x_ref (tm, K), w_ref (K, N), b_ref (1, N).
    acc = jnp.dot(x_ref[...], w_ref[...], preferred_element_type=jnp.float32)
    o_ref[...] = (acc + b_ref[...].astype(jnp.float32)).astype(o_ref.dtype)


def _linear_kernel(x_ref, w_ref, b_ref, o_ref, acc_ref, *, k_rem):
    # x_ref: (tm, tk), w_ref: (tk, tn)  (weight already transposed to (K, N)),
    # b_ref: (1, tn), o_ref: (tm, tn), acc_ref: (tm, tn) f32 scratch.
    k = pl.program_id(2)
    nk = pl.num_programs(2)

    @pl.when(k == 0)
    def _():
        # Fold the bias into the accumulator init (saves one VPU pass later).
        acc_ref[...] = jnp.broadcast_to(
            b_ref[...].astype(jnp.float32), acc_ref.shape
        )

    x = x_ref[...]
    w = w_ref[...]
    if k_rem:
        # Ragged K edge (no HBM padding): zero BOTH operands past K so garbage
        # (even NaN/Inf bit patterns) in the out-of-bounds block region cannot
        # corrupt the reduction.  Static python branch: zero cost when tk | K.
        lim = jnp.where(k == nk - 1, k_rem, x.shape[1])
        colx = lax.broadcasted_iota(jnp.int32, x.shape, 1)
        x = jnp.where(colx < lim, x, jnp.zeros_like(x))
        roww = lax.broadcasted_iota(jnp.int32, w.shape, 0)
        w = jnp.where(roww < lim, w, jnp.zeros_like(w))

    acc_ref[...] += jnp.dot(x, w, preferred_element_type=jnp.float32)

    @pl.when(k == nk - 1)
    def _():
        o_ref[...] = acc_ref[...].astype(o_ref.dtype)


# --------------------------------------------------------------------------- #
# wrapper: out = x @ weight.T + bias  (PyTorch nn.Linear semantics)
# --------------------------------------------------------------------------- #
def lr_forward(x, weight, bias, *, tm=None, tn=None, tk=None, allow_fast=True):
    """x: (B, K), weight: (N, K)  [PyTorch layout], bias: (N,) -> (B, N)."""
    B, K = x.shape
    N, K_w = weight.shape
    assert K == K_w, "weight inner dim must match x features"

    out_dtype = x.dtype
    isz = jnp.dtype(x.dtype).itemsize
    osz = jnp.dtype(out_dtype).itemsize
    wsz = jnp.dtype(weight.dtype).itemsize

    vmem_limit = _vmem_limit_bytes()
    big_vmem = vmem_limit >= 96 * 1024 * 1024  # v5e/v6e vs v7x

    sub = _sublane(x.dtype)
    if tm is None:
        tm = 1024 if big_vmem else 512
    if tn is None:
        tn = 1024 if big_vmem else 512
    if tk is None:
        tk = 1024

    # Shrink tiles to the problem while keeping (sublane, 128) alignment.
    tm = min(tm, _round_up(B, sub))
    tn = min(tn, _round_up(N, 128))

    # One-time transpose to (K, N): each weight tile then feeds the MXU directly,
    # with no per-tile XLU transpose stealing vector-extended slots.
    w_t = weight.T
    b2d = bias.reshape(1, N)

    flops = 2 * B * N * K

    # ----------------------- weight-resident fast path ----------------------- #
    # Whole weight + bias stay in VMEM; grid over the batch only, single dot per
    # tile, no K loop, no scratch accumulator, output written once lane-dense.
    fast_foot = K * N * wsz + N * 4 + 2 * tm * K * isz + 2 * tm * N * osz
    if allow_fast and fast_foot <= vmem_limit // 2:
        cost = pl.CostEstimate(
            flops=flops,
            transcendentals=0,
            bytes_accessed=B * K * isz + K * N * wsz + N * 4 + B * N * osz,
        )
        return pl.pallas_call(
            _linear_small_kernel,
            out_shape=jax.ShapeDtypeStruct((B, N), out_dtype),
            grid_spec=pltpu.PrefetchScalarGridSpec(
                num_scalar_prefetch=0,
                grid=(_cdiv(B, tm),),
                in_specs=[
                    pl.BlockSpec((tm, K), lambda i: (i, 0)),   # x tile (streams)
                    pl.BlockSpec((K, N), lambda i: (0, 0)),    # weight (resident)
                    pl.BlockSpec((1, N), lambda i: (0, 0)),    # bias (resident)
                ],
                out_specs=pl.BlockSpec((tm, N), lambda i: (i, 0)),
            ),
            compiler_params=pltpu.CompilerParams(
                dimension_semantics=("parallel",),
                vmem_limit_bytes=vmem_limit,
            ),
            cost_estimate=cost,
        )(x, w_t, b2d)

    # ------------------------------ general path ----------------------------- #
    tk = min(tk, K)
    k_rem = K % tk  # 0 when tk divides K; otherwise last K tile is masked in-kernel

    grid_m = _cdiv(B, tm)
    grid_n = _cdiv(N, tn)

    # v7x megacore: best-effort ensure the parallel (i, j) sub-grid has >= 2 tiles.
    while grid_m * grid_n < 2:
        if tn > 128 and _cdiv(N, tn // 2) >= 2:
            tn //= 2
            grid_n = _cdiv(N, tn)
        elif tm > sub and _cdiv(B, max(sub, _round_up(tm // 2, sub))) >= 2:
            tm = max(sub, _round_up(tm // 2, sub))
            grid_m = _cdiv(B, tm)
        else:
            break

    grid_k = _cdiv(K, tk)
    grid = (grid_m, grid_n, grid_k)

    cost = pl.CostEstimate(
        flops=flops,
        transcendentals=0,
        # x re-read per N sweep, weight re-read per M sweep
        bytes_accessed=(B * K * isz * grid_n + K * N * wsz * grid_m
                        + N * 4 + B * N * osz),
    )

    kernel = functools.partial(_linear_kernel, k_rem=k_rem)

    return pl.pallas_call(
        kernel,
        out_shape=jax.ShapeDtypeStruct((B, N), out_dtype),
        grid_spec=pltpu.PrefetchScalarGridSpec(
            num_scalar_prefetch=0,
            grid=grid,
            in_specs=[
                pl.BlockSpec((tm, tk), lambda i, j, k: (i, k)),   # x
                pl.BlockSpec((tk, tn), lambda i, j, k: (k, j)),   # weight (K, N)
                pl.BlockSpec((1, tn), lambda i, j, k: (0, j)),    # bias
            ],
            out_specs=pl.BlockSpec((tm, tn), lambda i, j, k: (i, j)),
            scratch_shapes=[pltpu.VMEM((tm, tn), jnp.float32)],
        ),
        compiler_params=pltpu.CompilerParams(
            dimension_semantics=("parallel", "parallel", "arbitrary"),
            vmem_limit_bytes=vmem_limit,
        ),
        cost_estimate=cost,
    )(x, w_t, b2d)


# --------------------------------------------------------------------------- #
# self-test
# --------------------------------------------------------------------------- #
if __name__ == "__main__":
    # --- small LR module shapes (exercises the weight-resident fast path) ---
    batch, input_size, output_size = 8, 32, 16

    key = jax.random.PRNGKey(0)
    kx, kw, kb = jax.random.split(key, 3)

    x = jax.random.normal(kx, (batch, input_size), dtype=jnp.float32)
    # Deterministic "init" mimicking nn.Linear's uniform(-1/sqrt(in), 1/sqrt(in))
    bound = 1.0 / jnp.sqrt(jnp.float32(input_size))
    weight = jax.random.uniform(
        kw, (output_size, input_size), dtype=jnp.float32, minval=-bound, maxval=bound
    )
    bias = jax.random.uniform(
        kb, (output_size,), dtype=jnp.float32, minval=-bound, maxval=bound
    )

    out = jax.block_until_ready(jax.jit(lr_forward)(x, weight, bias))
    ref = x @ weight.T + bias
    assert out.shape == (batch, output_size)
    assert jnp.allclose(out, ref, atol=1e-5, rtol=1e-5), "mismatch vs reference (small)"

    # --- medium shapes with default tiles (fast or general path, chip-dependent) ---
    kx2, kw2, kb2 = jax.random.split(jax.random.PRNGKey(1), 3)
    B2, K2, N2 = 384, 1152, 640
    x2 = jax.random.normal(kx2, (B2, K2), dtype=jnp.float32)
    w2 = jax.random.normal(kw2, (N2, K2), dtype=jnp.float32) * 0.02
    b2 = jax.random.normal(kb2, (N2,), dtype=jnp.float32)
    out2 = jax.block_until_ready(jax.jit(lr_forward)(x2, w2, b2))
    ref2 = x2 @ w2.T + b2
    assert jnp.allclose(out2, ref2, atol=2e-3, rtol=2e-3), "mismatch vs reference (medium)"

    # --- force the general tiled path: multi-step K with a ragged (masked) K edge,
    #     ragged N edge blocks, megacore-parallel (i, j) grid ---
    fwd_gen = jax.jit(
        functools.partial(lr_forward, tm=128, tn=256, tk=512, allow_fast=False)
    )
    out3 = jax.block_until_ready(fwd_gen(x2, w2, b2))
    assert jnp.allclose(out3, ref2, atol=2e-3, rtol=2e-3), "mismatch vs reference (general)"

    print("KERNEL_OK")
</pallas_src>

<mosaic_0001>
module attributes {stable_mosaic.version = 11 : i64} {
  func.func @_linear_small_kernel(%arg0: i32, %arg1: memref<8x32xf32, #tpu.memory_space<vmem>>, %arg2: memref<32x16xf32, #tpu.memory_space<vmem>>, %arg3: memref<1x16xf32, #tpu.memory_space<vmem>>, %arg4: memref<8x16xf32, #tpu.memory_space<vmem>>) attributes {dimension_semantics = [#tpu.dimension_semantics<parallel>], iteration_bounds = array<i64: 1>, scalar_prefetch = 0 : i64, scratch_operands = 0 : i64, tpu.core_type = #tpu.core_type<tc>, window_params = [{transform_indices = @transform_0, window_bounds = array<i64: 8, 32>}, {pipeline_mode = #tpu.pipeline_mode<synchronous>, transform_indices = @transform_1, window_bounds = array<i64: 32, 16>}, {pipeline_mode = #tpu.pipeline_mode<synchronous>, transform_indices = @transform_2, window_bounds = array<i64: 1, 16>}, {transform_indices = @transform_3, window_bounds = array<i64: 8, 16>}]} {
    %c0 = arith.constant 0 : index
    %c0_0 = arith.constant 0 : index
    %0 = vector.load %arg1[%c0, %c0_0] : memref<8x32xf32, #tpu.memory_space<vmem>>, vector<8x32xf32>
    %c0_1 = arith.constant 0 : index
    %c0_2 = arith.constant 0 : index
    %1 = vector.load %arg2[%c0_1, %c0_2] : memref<32x16xf32, #tpu.memory_space<vmem>>, vector<32x16xf32>
    %cst = arith.constant dense<0.000000e+00> : vector<8x16xf32>
    %2 = tpu.matmul %0, %1, %cst {dimension_numbers = #tpu.dot_dimension_numbers<[1], [0], [0], [1], [0, 0, 1, 1], [], []>} : vector<8x32xf32>, vector<32x16xf32>, vector<8x16xf32> -> vector<8x16xf32>
    %c0_3 = arith.constant 0 : index
    %c0_4 = arith.constant 0 : index
    %3 = vector.load %arg3[%c0_3, %c0_4] : memref<1x16xf32, #tpu.memory_space<vmem>>, vector<1x16xf32>
    %4 = vector.broadcast %3 : vector<1x16xf32> to vector<8x16xf32>
    %5 = arith.addf %2, %4 : vector<8x16xf32>
    %c0_5 = arith.constant 0 : index
    %c0_6 = arith.constant 0 : index
    %6 = vector.load %arg4[%c0_5, %c0_6] : memref<8x16xf32, #tpu.memory_space<vmem>>, vector<8x16xf32>
    tpu.vector_store %arg4[%c0_5, %c0_6], %5 {strides = array<i32>} : memref<8x16xf32, #tpu.memory_space<vmem>>, vector<8x16xf32>,
    return
  }
  func.func @transform_0(%arg0: i32) -> (i32, i32) {
    %c0_i32 = arith.constant 0 : i32
    %c0_i32_0 = arith.constant 0 : i32
    return %arg0, %c0_i32 : i32, i32
  }
  func.func @transform_1(%arg0: i32) -> (i32, i32) {
    %c0_i32 = arith.constant 0 : i32
    %c0_i32_0 = arith.constant 0 : i32
    %c0_i32_1 = arith.constant 0 : i32
    return %c0_i32, %c0_i32_0 : i32, i32
  }
  func.func @transform_2(%arg0: i32) -> (i32, i32) {
    %c0_i32 = arith.constant 0 : i32
    %c0_i32_0 = arith.constant 0 : i32
    %c0_i32_1 = arith.constant 0 : i32
    return %c0_i32, %c0_i32_0 : i32, i32
  }
  func.func @transform_3(%arg0: i32) -> (i32, i32) {
    %c0_i32 = arith.constant 0 : i32
    %c0_i32_0 = arith.constant 0 : i32
    return %arg0, %c0_i32 : i32, i32
  }
}

</mosaic_0001>

<bundles_post_ra>
// kernel: lr_forward.1
= control target key start
LH: loop header
LB: loop body
LE: loop exit
PB: predicated region body
PF: predicated region fallthrough
CT: control target
= control target key end

     0   :  { %v160_v1 = vmov 0.0   ;;  %vm161_vm0 = vmmov 0   ;;  %s204_s0 = inlined_call_operand.vmem [shape: f32[8,32], index: 0, kind: input, shape index: {}]   ;;  %s205_s1 = inlined_call_operand.vmem [shape: f32[32,16], index: 1, kind: input, shape index: {}]   ;;  %s206_s2 = inlined_call_operand.vmem [shape: f32[1,16], index: 2, kind: input, shape index: {}]   ;;  %s207_s3 = inlined_call_operand.hbm [shape: f32[8,16], index: 3, kind: output, shape index: {}]  }
   0x1   :  { %v19_v0 = vld [vmem:[%s205_s1 + $0x18] sm:$0xff]  ;;  %124 = vmatprep.subr.mxu0 %v160_v1  ;;  %v18_v2 = vld [vmem:[%s205_s1 + $0x10] sm:$0xff]  ;;  %132 = vmatprep.mubr.msk.f32.mxu0 %vm161_vm0, %v160_v1 }
   0x2   :  { %125 = vmatpush3.msra.mxu0 %v19_v0 }
   0x3   :  { %8 = vsyncpa [#allocation3], 0  ;;  %126 = vmatprep.subr.mxu0 %v160_v1  ;;  %v17_v3 = vld [vmem:[%s205_s1 + $0x8] sm:$0xff]  ;;  %v16_v4 = vld [vmem:[%s205_s1] sm:$0xff]  ;;  %vm27_vm1 = vcmask 261120   ;;  %s162_s24 = smov [#allocation2]  }
   0x4   :  { %127 = vmatpush3.msra.mxu0 %v18_v2  ;;  %v15_v5 = vld [vmem:[%s204_s0] sm:$0xff]  ;;  %s109_s25 = sshll.u32 %s162_s24, 4  ;;  %vm101_vm2 = vcmask 130048   ;;  %s110_s25 = int_to_ptr.vmem [resolvable:$true] %s109_s25 }
   0x5   :  { %128 = vmatprep.subr.mxu0 %v160_v1  ;;  %v117_v6 = vld [vmem:[%s206_s2] ss:$0 sm:$0xff]  ;;  %s138_s1 = scalar_lea.vmem %s110_s25, 128  ;;  %p143_p1 = scmp.lt.s32.totalorder %s110_s25, %s110_s25 }
   0x6   :  { %129 = vmatpush3.msra.mxu0 %v17_v3  ;;  %p139_p0 = scmp.ne.s32.totalorder %s110_s25, %s138_s1  ;;  %p144_p2 = scmp.lt.s32.totalorder %s138_s1, %s138_s1 }
   0x7   :  { %130 = vmatprep.subr.mxu0 %v160_v1 }
   0x8   :  { %131 = vmatpush3.msra.mxu0 %v16_v4  ;;  %p145_p3 = por %p144_p2, %p143_p1 }
   0x9   :  { %133 = vmatmul.mubr.msk.f32.vlgmr.msra.gmra.mxu0 %vm27_vm1, %v15_v5 }
   0xa   :  { %p146_p4 = pnand %p145_p3, %p139_p0 }
  0xc9   :  { %v97_v7 = vpop.f32.mrf.mxu0 }
  0xca   :  { %v98_v8 = vadd.f32 %v117_v6, %v97_v7 }
  0xcb   :  { %v134_v9 = vpop.f32.mrf.mxu0 }
  0xcc   :  { %102 = vst.msk [vmem:[#allocation2] sm:$0xff] %vm101_vm2, %v98_v8 }
  0xcd   :  { %149 = shalt.err (!%p146_p4)
}
  0xce   :  { %112 = dma.vmem_to_hbm [thread:$0]  %s110_s25, 128, %s207_s3, [#allocation3]  }
  0xcf   :  { %158 = dma.done.wait [#allocation3], 128  }
  0xd0   :  { %159 = vsyncadd [#allocation3], 4294967168 }
  0xd1   :  { %116 = vsyncpa [#allocation3], 1 }

</bundles_post_ra>
